<compile_context>
chip_gen: v5e
topology: v5e:2x2
jax: 0.10.0
libtpu: 0.0.40
codegen_flags: <defaults>
</compile_context>

<pallas_src>
import functools

import jax
import jax.numpy as jnp
from jax.experimental import pallas as pl
from jax.experimental.pallas import tpu as pltpu


def _round_up(x, m):
    return ((x + m - 1) // m) * m


def glove_kernel(wv_ref, cv_ref, wb_ref, cb_ref, out_ref):
    # wv_ref / cv_ref : (TILE_B, D)  -- batch on sublanes, embedding on lanes.
    # wb_ref / cb_ref / out_ref : (TILE_B, 1)
    prod = wv_ref[...] * cv_ref[...]
    dots = jnp.sum(prod, axis=-1, keepdims=True)          # lane reduce -> (TILE_B, 1)
    out_ref[...] = dots + wb_ref[...] + cb_ref[...]


@functools.partial(jax.jit, static_argnames=("tile_b",))
def glove_forward(word_idx, context_idx, emb_w, emb_c, bias_w, bias_c,
                  tile_b=2048):
    """prediction[b] = sum(emb_w[w[b]] * emb_c[c[b]]) + bias_w[w[b]] + bias_c[c[b]]"""
    B = word_idx.shape[0]
    V, D = emb_w.shape

    # Batch tile: lane-aligned multiple of 128, shrunk if the double-buffered
    # embedding inputs would exceed ~24 MiB of VMEM (v7x-safe budget).
    TILE_B = _round_up(min(tile_b, _round_up(B, 128)), 128)
    vmem_budget = 24 * 1024 * 1024
    while TILE_B > 128 and 2 * 2 * TILE_B * D * 4 > vmem_budget:
        TILE_B = _round_up(TILE_B // 2, 128)
    Bp = _round_up(B, TILE_B)

    widx = jnp.pad(word_idx.astype(jnp.int32), (0, Bp - B))      # pad with idx 0
    cidx = jnp.pad(context_idx.astype(jnp.int32), (0, Bp - B))

    # Dense XLA gathers, natural [Bp, D] layout (no transpose, no feature pad).
    wv = jnp.take(emb_w, widx, axis=0)                    # (Bp, D)
    cv = jnp.take(emb_c, cidx, axis=0)                    # (Bp, D)
    wb = jnp.take(bias_w, widx, axis=0)                   # (Bp, 1)
    cb = jnp.take(bias_c, cidx, axis=0)                   # (Bp, 1)

    out = pl.pallas_call(
        glove_kernel,
        out_shape=jax.ShapeDtypeStruct((Bp, 1), jnp.float32),
        grid=(Bp // TILE_B,),
        in_specs=[
            pl.BlockSpec((TILE_B, D), lambda i: (i, 0)),
            pl.BlockSpec((TILE_B, D), lambda i: (i, 0)),
            pl.BlockSpec((TILE_B, 1), lambda i: (i, 0)),
            pl.BlockSpec((TILE_B, 1), lambda i: (i, 0)),
        ],
        out_specs=pl.BlockSpec((TILE_B, 1), lambda i: (i, 0)),
        compiler_params=pltpu.CompilerParams(
            dimension_semantics=("parallel",),      # independent batch tiles
            vmem_limit_bytes=32 * 1024 * 1024,      # explicit raise for v5e
        ),
    )(wv, cv, wb, cb)

    # Drop batch padding; output already matches the torch (B, 1) shape.
    return out[:B]


def init_params(key, vocab_size, embedding_dim):
    # Matches torch: xavier_uniform_ for embeddings, zeros for biases.
    k1, k2 = jax.random.split(key)
    bound = (6.0 / (vocab_size + embedding_dim)) ** 0.5
    emb_w = jax.random.uniform(k1, (vocab_size, embedding_dim),
                               minval=-bound, maxval=bound, dtype=jnp.float32)
    emb_c = jax.random.uniform(k2, (vocab_size, embedding_dim),
                               minval=-bound, maxval=bound, dtype=jnp.float32)
    bias_w = jnp.zeros((vocab_size, 1), dtype=jnp.float32)
    bias_c = jnp.zeros((vocab_size, 1), dtype=jnp.float32)
    return emb_w, emb_c, bias_w, bias_c


if __name__ == "__main__":
    vocab_size = 64
    embedding_dim = 32
    batch = 8

    key = jax.random.PRNGKey(0)
    kp, kw, kc = jax.random.split(key, 3)

    emb_w, emb_c, bias_w, bias_c = init_params(kp, vocab_size, embedding_dim)
    word_idx = jax.random.randint(kw, (batch,), 0, vocab_size, dtype=jnp.int32)
    context_idx = jax.random.randint(kc, (batch,), 0, vocab_size, dtype=jnp.int32)

    out = glove_forward(word_idx, context_idx, emb_w, emb_c, bias_w, bias_c)
    out = jax.block_until_ready(out)

    # Pure-JAX reference for sanity.
    wv = jnp.take(emb_w, word_idx, axis=0)
    cv = jnp.take(emb_c, context_idx, axis=0)
    wbr = jnp.take(bias_w, word_idx, axis=0)
    cbr = jnp.take(bias_c, context_idx, axis=0)
    ref = jnp.sum(wv * cv, axis=1, keepdims=True) + wbr + cbr

    assert out.shape == (batch, 1)
    assert jnp.allclose(out, ref, atol=1e-5, rtol=1e-5)
    print("KERNEL_OK")
</pallas_src>

<mosaic_0001>
module attributes {stable_mosaic.version = 11 : i64} {
  func.func @glove_kernel(%arg0: i32, %arg1: memref<128x32xf32, #tpu.memory_space<vmem>>, %arg2: memref<128x32xf32, #tpu.memory_space<vmem>>, %arg3: memref<128x1xf32, #tpu.memory_space<vmem>>, %arg4: memref<128x1xf32, #tpu.memory_space<vmem>>, %arg5: memref<128x1xf32, #tpu.memory_space<vmem>>) attributes {dimension_semantics = [#tpu.dimension_semantics<parallel>], iteration_bounds = array<i64: 1>, scalar_prefetch = 0 : i64, scratch_operands = 0 : i64, tpu.core_type = #tpu.core_type<tc>, window_params = [{transform_indices = @transform_0, window_bounds = array<i64: 128, 32>}, {transform_indices = @transform_1, window_bounds = array<i64: 128, 32>}, {transform_indices = @transform_2, window_bounds = array<i64: 128, 1>}, {transform_indices = @transform_3, window_bounds = array<i64: 128, 1>}, {transform_indices = @transform_4, window_bounds = array<i64: 128, 1>}]} {
    %c0 = arith.constant 0 : index
    %c0_0 = arith.constant 0 : index
    %0 = vector.load %arg1[%c0, %c0_0] : memref<128x32xf32, #tpu.memory_space<vmem>>, vector<128x32xf32>
    %c0_1 = arith.constant 0 : index
    %c0_2 = arith.constant 0 : index
    %1 = vector.load %arg2[%c0_1, %c0_2] : memref<128x32xf32, #tpu.memory_space<vmem>>, vector<128x32xf32>
    %2 = arith.mulf %0, %1 : vector<128x32xf32>
    %cst = arith.constant dense<0.000000e+00> : vector<128xf32>
    %3 = vector.multi_reduction <add>, %2, %cst [1] : vector<128x32xf32> to vector<128xf32>
    %4 = vector.shape_cast %3 : vector<128xf32> to vector<128x1xf32>
    %c0_3 = arith.constant 0 : index
    %c0_4 = arith.constant 0 : index
    %5 = vector.load %arg3[%c0_3, %c0_4] : memref<128x1xf32, #tpu.memory_space<vmem>>, vector<128x1xf32>
    %6 = arith.addf %4, %5 : vector<128x1xf32>
    %c0_5 = arith.constant 0 : index
    %c0_6 = arith.constant 0 : index
    %7 = vector.load %arg4[%c0_5, %c0_6] : memref<128x1xf32, #tpu.memory_space<vmem>>, vector<128x1xf32>
    %8 = arith.addf %6, %7 : vector<128x1xf32>
    %c0_7 = arith.constant 0 : index
    %c0_8 = arith.constant 0 : index
    %9 = vector.load %arg5[%c0_7, %c0_8] : memref<128x1xf32, #tpu.memory_space<vmem>>, vector<128x1xf32>
    tpu.vector_store %arg5[%c0_7, %c0_8], %8 {strides = array<i32>} : memref<128x1xf32, #tpu.memory_space<vmem>>, vector<128x1xf32>,
    return
  }
  func.func @transform_0(%arg0: i32) -> (i32, i32) {
    %c0_i32 = arith.constant 0 : i32
    %c0_i32_0 = arith.constant 0 : i32
    return %arg0, %c0_i32 : i32, i32
  }
  func.func @transform_1(%arg0: i32) -> (i32, i32) {
    %c0_i32 = arith.constant 0 : i32
    %c0_i32_0 = arith.constant 0 : i32
    return %arg0, %c0_i32 : i32, i32
  }
  func.func @transform_2(%arg0: i32) -> (i32, i32) {
    %c0_i32 = arith.constant 0 : i32
    %c0_i32_0 = arith.constant 0 : i32
    return %arg0, %c0_i32 : i32, i32
  }
  func.func @transform_3(%arg0: i32) -> (i32, i32) {
    %c0_i32 = arith.constant 0 : i32
    %c0_i32_0 = arith.constant 0 : i32
    return %arg0, %c0_i32 : i32, i32
  }
  func.func @transform_4(%arg0: i32) -> (i32, i32) {
    %c0_i32 = arith.constant 0 : i32
    %c0_i32_0 = arith.constant 0 : i32
    return %arg0, %c0_i32 : i32, i32
  }
}

</mosaic_0001>

<bundles_post_ra>
// kernel: glove_forward.1
= control target key start
LH: loop header
LB: loop body
LE: loop exit
PB: predicated region body
PF: predicated region fallthrough
CT: control target
= control target key end

     0   :  { %vm65_vm0 = vcmask 261120   ;;  %vm178_vm1 = vcmask 7168   ;;  %s496_s0 = inlined_call_operand.vmem [shape: f32[128,32], index: 0, kind: input, shape index: {}]   ;;  %s497_s1 = inlined_call_operand.vmem [shape: f32[128,32], index: 1, kind: input, shape index: {}]   ;;  %s498_s2 = inlined_call_operand.vmem [shape: f32[128,1], index: 2, kind: input, shape index: {}]   ;;  %s499_s3 = inlined_call_operand.vmem [shape: f32[128,1], index: 3, kind: input, shape index: {}]   ;;  %s500_s4 = inlined_call_operand.vmem [shape: f32[128,1], index: 4, kind: output, shape index: {}]  }
   0x1   :  { %v17_v0 = vld [vmem:[%s496_s0] sm:$0xff]  ;;  %v19_v5 = vld [vmem:[%s496_s0 + $0x10] sm:$0xff]  ;;  %v18_v9 = vld [vmem:[%s496_s0 + $0x8] sm:$0xff] }
   0x2   :  { %v33_v1 = vld [vmem:[%s497_s1] sm:$0xff]  ;;  %v35_v6 = vld [vmem:[%s497_s1 + $0x10] sm:$0xff]  ;;  %v34_v10 = vld [vmem:[%s497_s1 + $0x8] sm:$0xff] }
   0x3   :  { %v21_v2 = vld [vmem:[%s496_s0 + $0x20] sm:$0xff]  ;;  %v49_v3 = vmul.f32 %v33_v1, %v17_v0  ;;  %v51_v8 = vmul.f32 %v35_v6, %v19_v5  ;;  %v22_v11 = vld [vmem:[%s496_s0 + $0x28] sm:$0xff]  ;;  %v20_v14 = vld [vmem:[%s496_s0 + $0x18] sm:$0xff]  ;;  %v50_v18 = vmul.f32 %v34_v10, %v18_v9 }
   0x4   :  { %v37_v4 = vld [vmem:[%s497_s1 + $0x20] sm:$0xff]  ;;  %v38_v13 = vld [vmem:[%s497_s1 + $0x28] sm:$0xff]  ;;  %v36_v15 = vld [vmem:[%s497_s1 + $0x18] sm:$0xff] }
   0x5   :  { %v53_v7 = vmul.f32 %v37_v4, %v21_v2  ;;  %v66_v12 = vsel %vm65_vm0, %v49_v3, 0.0  ;;  %v72_v17 = vsel %vm65_vm0, %v51_v8, 0.0  ;;  %v54_v19 = vmul.f32 %v38_v13, %v22_v11  ;;  %v23_v24 = vld [vmem:[%s496_s0 + $0x30] sm:$0xff]  ;;  %v25_v26 = vld [vmem:[%s496_s0 + $0x40] sm:$0xff]  ;;  %v24_v28 = vld [vmem:[%s496_s0 + $0x38] sm:$0xff] }
   0x6   :  { %67 = vadd.xlane.f32.xlu0 %v66_v12  ;;  %73 = vadd.xlane.f32.xlu1 %v72_v17  ;;  %v52_v20 = vmul.f32 %v36_v15, %v20_v14  ;;  %v69_v21 = vsel %vm65_vm0, %v50_v18, 0.0  ;;  %v39_v25 = vld [vmem:[%s497_s1 + $0x30] sm:$0xff]  ;;  %v41_v27 = vld [vmem:[%s497_s1 + $0x40] sm:$0xff]  ;;  %v40_v29 = vld [vmem:[%s497_s1 + $0x38] sm:$0xff] }
   0x7   :  { %v78_v16 = vsel %vm65_vm0, %v53_v7, 0.0  ;;  %v81_v22 = vsel %vm65_vm0, %v54_v19, 0.0  ;;  %v55_v30 = vmul.f32 %v39_v25, %v23_v24  ;;  %v57_v31 = vmul.f32 %v41_v27, %v25_v26  ;;  %v26_v36 = vld [vmem:[%s496_s0 + $0x48] sm:$0xff]  ;;  %v28_v38 = vld [vmem:[%s496_s0 + $0x58] sm:$0xff]  ;;  %v27_v40 = vld [vmem:[%s496_s0 + $0x50] sm:$0xff] }
   0x8   :  { %79 = vadd.xlane.f32.xlu2 %v78_v16  ;;  %v75_v23 = vsel %vm65_vm0, %v52_v20, 0.0  ;;  %v56_v32 = vmul.f32 %v40_v29, %v24_v28  ;;  %v42_v37 = vld [vmem:[%s497_s1 + $0x48] sm:$0xff]  ;;  %v44_v39 = vld [vmem:[%s497_s1 + $0x58] sm:$0xff]  ;;  %v43_v41 = vld [vmem:[%s497_s1 + $0x50] sm:$0xff] }
   0x9   :  { %v84_v33 = vsel %vm65_vm0, %v55_v30, 0.0  ;;  %v90_v34 = vsel %vm65_vm0, %v57_v31, 0.0  ;;  %v58_v42 = vmul.f32 %v42_v37, %v26_v36  ;;  %v60_v43 = vmul.f32 %v44_v39, %v28_v38  ;;  %v29_v48 = vld [vmem:[%s496_s0 + $0x60] sm:$0xff]  ;;  %v31_v50 = vld [vmem:[%s496_s0 + $0x70] sm:$0xff]  ;;  %v30_v52 = vld [vmem:[%s496_s0 + $0x68] sm:$0xff] }
   0xa   :  { %v87_v35 = vsel %vm65_vm0, %v56_v32, 0.0  ;;  %v59_v44 = vmul.f32 %v43_v41, %v27_v40  ;;  %v45_v49 = vld [vmem:[%s497_s1 + $0x60] sm:$0xff]  ;;  %v47_v51 = vld [vmem:[%s497_s1 + $0x70] sm:$0xff]  ;;  %v46_v53 = vld [vmem:[%s497_s1 + $0x68] sm:$0xff] }
   0xb   :  { %v93_v45 = vsel %vm65_vm0, %v58_v42, 0.0  ;;  %v99_v46 = vsel %vm65_vm0, %v60_v43, 0.0  ;;  %v61_v54 = vmul.f32 %v45_v49, %v29_v48  ;;  %v63_v55 = vmul.f32 %v47_v51, %v31_v50  ;;  %v32_v60 = vld [vmem:[%s496_s0 + $0x78] sm:$0xff]  ;;  %v114_v0 = vld [vmem:[%s498_s2] sm:$0xff]  ;;  %v116_v2 = vld [vmem:[%s498_s2 + $0x10] sm:$0xff] }
   0xc   :  { %v96_v47 = vsel %vm65_vm0, %v59_v44, 0.0  ;;  %v62_v56 = vmul.f32 %v46_v53, %v30_v52  ;;  %v48_v61 = vld [vmem:[%s497_s1 + $0x78] sm:$0xff]  ;;  %v118_v1 = vld [vmem:[%s498_s2 + $0x20] sm:$0xff]  ;;  %v148_v8 = vld [vmem:[%s499_s3 + $0x10] sm:$0xff] }
   0xd   :  { %v102_v57 = vsel %vm65_vm0, %v61_v54, 0.0  ;;  %v108_v58 = vsel %vm65_vm0, %v63_v55, 0.0  ;;  %v64_v62 = vmul.f32 %v48_v61, %v32_v60  ;;  %v146_v3 = vld [vmem:[%s499_s3] sm:$0xff]  ;;  %v115_v15 = vld [vmem:[%s498_s2 + $0x8] sm:$0xff]  ;;  %v117_v17 = vld [vmem:[%s498_s2 + $0x18] sm:$0xff] }
   0xe   :  { %70 = vadd.xlane.f32.xlu0 %v69_v21  ;;  %76 = vadd.xlane.f32.xlu1 %v75_v23  ;;  %v105_v59 = vsel %vm65_vm0, %v62_v56, 0.0  ;;  %v150_v6 = vld [vmem:[%s499_s3 + $0x20] sm:$0xff]  ;;  %v119_v16 = vld [vmem:[%s498_s2 + $0x28] sm:$0xff]  ;;  %v149_v23 = vld [vmem:[%s499_s3 + $0x18] sm:$0xff] }
   0xf   :  { %v111_v63 = vsel %vm65_vm0, %v64_v62, 0.0  ;;  %v147_v18 = vld [vmem:[%s499_s3 + $0x8] sm:$0xff]  ;;  %v120_v30 = vld [vmem:[%s498_s2 + $0x30] sm:$0xff]  ;;  %v122_v31 = vld [vmem:[%s498_s2 + $0x40] sm:$0xff] }
  0x10   :  { %82 = vadd.xlane.f32.xlu2 %v81_v22  ;;  %v151_v21 = vld [vmem:[%s499_s3 + $0x28] sm:$0xff]  ;;  %v121_v32 = vld [vmem:[%s498_s2 + $0x38] sm:$0xff]  ;;  %v154_v36 = vld [vmem:[%s499_s3 + $0x40] sm:$0xff] }
  0x11   :  { %v153_v38 = vld [vmem:[%s499_s3 + $0x38] sm:$0xff]  ;;  %v155_v48 = vld [vmem:[%s499_s3 + $0x48] sm:$0xff]  ;;  %v156_v53 = vld [vmem:[%s499_s3 + $0x50] sm:$0xff] }
  0x12   :  { %v157_v51 = vld [vmem:[%s499_s3 + $0x58] sm:$0xff]  ;;  %v126_v60 = vld [vmem:[%s498_s2 + $0x60] sm:$0xff]  ;;  %v128_v61 = vld [vmem:[%s498_s2 + $0x70] sm:$0xff] }
  0x13   :  { %v127_v62 = vld [vmem:[%s498_s2 + $0x68] sm:$0xff] }
  0x16   :  { %85 = vadd.xlane.f32.xlu0 %v84_v33  ;;  %88 = vadd.xlane.f32.xlu1 %v87_v35  ;;  %v152_v33 = vld [vmem:[%s499_s3 + $0x30] sm:$0xff] }
  0x18   :  { %91 = vadd.xlane.f32.xlu2 %v90_v34 }
  0x1e   :  { %94 = vadd.xlane.f32.xlu0 %v93_v45  ;;  %97 = vadd.xlane.f32.xlu1 %v96_v47  ;;  %v123_v45 = vld [vmem:[%s498_s2 + $0x48] sm:$0xff]  ;;  %v124_v47 = vld [vmem:[%s498_s2 + $0x50] sm:$0xff] }
  0x20   :  { %100 = vadd.xlane.f32.xlu2 %v99_v46  ;;  %v125_v46 = vld [vmem:[%s498_s2 + $0x58] sm:$0xff] }
  0x26   :  { %103 = vadd.xlane.f32.xlu0 %v102_v57  ;;  %106 = vadd.xlane.f32.xlu1 %v105_v59 }
  0x28   :  { %109 = vadd.xlane.f32.xlu2 %v108_v58 }
  0x2e   :  { %112 = vadd.xlane.f32.xlu0 %v111_v63  ;;  %v158_v63 = vld [vmem:[%s499_s3 + $0x60] sm:$0xff] }
  0x79   :  { %v68_v4 = vpop.xlane.xlu0 %67  ;;  %v74_v9 = vpop.xlane.xlu1 %73 }
  0x7a   :  { %v130_v5 = vadd.f32 %v114_v0, %v68_v4  ;;  %v132_v11 = vadd.f32 %v116_v2, %v74_v9  ;;  %v160_v2 = vld [vmem:[%s499_s3 + $0x70] sm:$0xff]  ;;  %v159_v4 = vld [vmem:[%s499_s3 + $0x68] sm:$0xff] }
  0x7b   :  { %v80_v7 = vpop.xlane.xlu2 %79 }
  0x7c   :  { %v134_v10 = vadd.f32 %v118_v1, %v80_v7  ;;  %v162_v12 = vadd.f32 %v146_v3, %v130_v5  ;;  %v164_v14 = vadd.f32 %v148_v8, %v132_v11  ;;  %v129_v11 = vld [vmem:[%s498_s2 + $0x78] sm:$0xff] }
  0x7e   :  { %v166_v13 = vadd.f32 %v150_v6, %v134_v10  ;;  %179 = vst.msk [vmem:[%s500_s4] sm:$0xff] %vm178_vm1, %v162_v12  ;;  %v161_v12 = vld [vmem:[%s499_s3 + $0x78] sm:$0xff] }
  0x7f   :  { %181 = vst.msk [vmem:[%s500_s4 + $0x10] sm:$0xff] %vm178_vm1, %v164_v14 }
  0x80   :  { %183 = vst.msk [vmem:[%s500_s4 + $0x20] sm:$0xff] %vm178_vm1, %v166_v13 }
  0x81   :  { %v71_v19 = vpop.xlane.xlu0 %70  ;;  %v77_v24 = vpop.xlane.xlu1 %76 }
  0x82   :  { %v131_v20 = vadd.f32 %v115_v15, %v71_v19  ;;  %v133_v26 = vadd.f32 %v117_v17, %v77_v24 }
  0x83   :  { %v83_v22 = vpop.xlane.xlu2 %82 }
  0x84   :  { %v135_v25 = vadd.f32 %v119_v16, %v83_v22  ;;  %v163_v27 = vadd.f32 %v147_v18, %v131_v20  ;;  %v165_v29 = vadd.f32 %v149_v23, %v133_v26 }
  0x86   :  { %v167_v28 = vadd.f32 %v151_v21, %v135_v25  ;;  %180 = vst.msk [vmem:[%s500_s4 + $0x8] sm:$0xff] %vm178_vm1, %v163_v27 }
  0x87   :  { %182 = vst.msk [vmem:[%s500_s4 + $0x18] sm:$0xff] %vm178_vm1, %v165_v29 }
  0x88   :  { %184 = vst.msk [vmem:[%s500_s4 + $0x28] sm:$0xff] %vm178_vm1, %v167_v28 }
  0x89   :  { %v86_v34 = vpop.xlane.xlu0 %85  ;;  %v89_v39 = vpop.xlane.xlu1 %88 }
  0x8a   :  { %v136_v35 = vadd.f32 %v120_v30, %v86_v34  ;;  %v137_v41 = vadd.f32 %v121_v32, %v89_v39 }
  0x8b   :  { %v92_v37 = vpop.xlane.xlu2 %91 }
  0x8c   :  { %v138_v40 = vadd.f32 %v122_v31, %v92_v37  ;;  %v168_v42 = vadd.f32 %v152_v33, %v136_v35  ;;  %v169_v44 = vadd.f32 %v153_v38, %v137_v41 }
  0x8e   :  { %v170_v43 = vadd.f32 %v154_v36, %v138_v40  ;;  %185 = vst.msk [vmem:[%s500_s4 + $0x30] sm:$0xff] %vm178_vm1, %v168_v42 }
  0x8f   :  { %186 = vst.msk [vmem:[%s500_s4 + $0x38] sm:$0xff] %vm178_vm1, %v169_v44 }
  0x90   :  { %187 = vst.msk [vmem:[%s500_s4 + $0x40] sm:$0xff] %vm178_vm1, %v170_v43 }
  0x91   :  { %v95_v49 = vpop.xlane.xlu0 %94  ;;  %v98_v54 = vpop.xlane.xlu1 %97 }
  0x92   :  { %v139_v50 = vadd.f32 %v123_v45, %v95_v49  ;;  %v140_v56 = vadd.f32 %v124_v47, %v98_v54 }
  0x93   :  { %v101_v52 = vpop.xlane.xlu2 %100 }
  0x94   :  { %v141_v55 = vadd.f32 %v125_v46, %v101_v52  ;;  %v171_v57 = vadd.f32 %v155_v48, %v139_v50  ;;  %v172_v59 = vadd.f32 %v156_v53, %v140_v56 }
  0x96   :  { %v173_v58 = vadd.f32 %v157_v51, %v141_v55  ;;  %188 = vst.msk [vmem:[%s500_s4 + $0x48] sm:$0xff] %vm178_vm1, %v171_v57 }
  0x97   :  { %189 = vst.msk [vmem:[%s500_s4 + $0x50] sm:$0xff] %vm178_vm1, %v172_v59 }
  0x98   :  { %190 = vst.msk [vmem:[%s500_s4 + $0x58] sm:$0xff] %vm178_vm1, %v173_v58 }
  0x99   :  { %v104_v0 = vpop.xlane.xlu0 %103  ;;  %v107_v5 = vpop.xlane.xlu1 %106 }
  0x9a   :  { %v142_v1 = vadd.f32 %v126_v60, %v104_v0  ;;  %v143_v7 = vadd.f32 %v127_v62, %v107_v5 }
  0x9b   :  { %v110_v3 = vpop.xlane.xlu2 %109 }
  0x9c   :  { %v144_v6 = vadd.f32 %v128_v61, %v110_v3  ;;  %v174_v8 = vadd.f32 %v158_v63, %v142_v1  ;;  %v175_v10 = vadd.f32 %v159_v4, %v143_v7 }
  0x9e   :  { %v176_v9 = vadd.f32 %v160_v2, %v144_v6  ;;  %191 = vst.msk [vmem:[%s500_s4 + $0x60] sm:$0xff] %vm178_vm1, %v174_v8 }
  0x9f   :  { %192 = vst.msk [vmem:[%s500_s4 + $0x68] sm:$0xff] %vm178_vm1, %v175_v10 }
  0xa0   :  { %193 = vst.msk [vmem:[%s500_s4 + $0x70] sm:$0xff] %vm178_vm1, %v176_v9 }
  0xa1   :  { %v113_v13 = vpop.xlane.xlu0 %112 }
  0xa2   :  { %v145_v14 = vadd.f32 %v129_v11, %v113_v13 }
  0xa4   :  { %v177_v15 = vadd.f32 %v161_v12, %v145_v14 }
  0xa6   :  { %194 = vst.msk [vmem:[%s500_s4 + $0x78] sm:$0xff] %vm178_vm1, %v177_v15 }

</bundles_post_ra>
